<compile_context>
chip_gen: v5e
topology: v5e:2x2
jax: 0.10.0
libtpu: 0.0.40
codegen_flags: <defaults>
</compile_context>

<pallas_src>
import jax
import jax.numpy as jnp
from jax.experimental import pallas as pl
from jax.experimental.pallas import tpu as pltpu

_N_SHC = 45  # anisotropic SH coefficients per gradient direction (x has 45 + iso + trap = 47)


def _round_up(x, m):
    return ((x + m - 1) // m) * m


def _reconstruction_kernel(a_ref, x_ref, iso_ref, table_ref, rep_ref, sel_ref, out_ref):
    # a_ref:     (TN, G*45)  packed per-voxel mixing matrices (lane-dense)
    # x_ref:     (TN, 47)    spherical-harmonic coefficients per voxel
    # iso_ref:   (TN, 1)     isotropic diffusivity per voxel
    # table_ref: (1, G)      b-value / gradient table
    # rep_ref:   (45, G*45)  0/1 replication matrix: R[b, g*45+b'] = (b == b')
    # sel_ref:   (G*45, G)   0/1 selection  matrix: S[g*45+b, g'] = (g == g')
    # out_ref:   (TN, G)
    a = a_ref[...].astype(jnp.float32)          # (TN, G*45)
    x = x_ref[...].astype(jnp.float32)          # (TN, 47)
    iso = iso_ref[...].astype(jnp.float32)      # (TN, 1)
    tab = table_ref[...].astype(jnp.float32)    # (1, G)

    x_shc = x[:, :_N_SHC]                       # (TN, 45)
    x_iso = x[:, _N_SHC:_N_SHC + 1]             # (TN, 1)
    x_trap = x[:, _N_SHC + 1:_N_SHC + 2]        # (TN, 1)

    # Replicate x_shc across the G gradient groups, lane-dense, on the MXU:
    #   x_rep[v, g*45 + b] = x_shc[v, b]
    x_rep = jnp.dot(x_shc, rep_ref[...], preferred_element_type=jnp.float32)   # (TN, G*45)
    prod = a * x_rep                                                            # (TN, G*45)
    # Segmented lane-sum over each group of 45 coefficients (MXU again):
    #   intra[v, g] = sum_b A[v, g, b] * x[v, b]
    intra = jnp.dot(prod, sel_ref[...], preferred_element_type=jnp.float32)     # (TN, G)

    # extra + trap terms (EUP exp, VPU broadcasts).
    beta = jnp.exp(-iso * tab)                  # (TN, G)
    out = intra + beta * x_iso + x_trap         # (TN, G)
    out_ref[...] = out.astype(out_ref.dtype)


def reconstruction_pallas(x_equi_shc, iso, table, A, *,
                          tile_voxels=1024,
                          vmem_limit_bytes=48 * 1024 * 1024):
    """Pallas implementation of Reconstruction.forward.

    Args:
      x_equi_shc: [i, j, k, 47]      SH coefficients (f32 or bf16).
      iso:        [i, j, k]          isotropic diffusivities.
      table:      [G]                gradient table.
      A:          [i, j, k, G, 45]   per-voxel reconstruction matrices.
      tile_voxels: voxels per grid step. 1024 keeps double-buffered inputs +
        temporaries well under 32 MiB (safe on v5e/v6e/v7x); with the packed A
        layout 2048 also fits if vmem_limit_bytes is raised.
    Returns:
      [i, j, k, G]
    """
    di, dj, dk, B = x_equi_shc.shape
    assert B == _N_SHC + 2, "Reconstruction semantics require 47 SH coefficients"
    assert A.shape[:3] == (di, dj, dk) and A.shape[4] == _N_SHC
    G = A.shape[3]
    GB = G * _N_SHC

    N = di * dj * dk
    # Free, contiguous repack: (N, G, 45) -> (N, G*45); lane-dense in VMEM.
    A_f = A.reshape(N, GB)
    x_f = x_equi_shc.reshape(N, B)
    iso_f = iso.reshape(N, 1)
    table_f = table.reshape(1, G)

    # Voxel tile: multiple of 8 (sublane); pad N up to a multiple of TN so odd
    # volumes never degenerate into one giant block (padded voxels are zero and
    # are sliced off below).  For real volumes grid >> 2, so both v7x cores get work.
    TN = min(_round_up(tile_voxels, 8), _round_up(N, 8))
    N_pad = _round_up(N, TN)
    if N_pad != N:
        pad = N_pad - N
        A_f = jnp.pad(A_f, ((0, pad), (0, 0)))
        x_f = jnp.pad(x_f, ((0, pad), (0, 0)))
        iso_f = jnp.pad(iso_f, ((0, pad), (0, 0)))
    grid = (N_pad // TN,)

    # Constant 0/1 helper matrices (resident in VMEM across the whole grid:
    # their block index never changes, so they are DMA'd once).
    c_idx = jnp.arange(GB, dtype=jnp.int32)
    rep = (c_idx[None, :] % _N_SHC ==
           jnp.arange(_N_SHC, dtype=jnp.int32)[:, None]).astype(jnp.float32)   # (45, G*45)
    sel = (c_idx[:, None] // _N_SHC ==
           jnp.arange(G, dtype=jnp.int32)[None, :]).astype(jnp.float32)        # (G*45, G)

    a_bytes = jnp.dtype(A.dtype).itemsize
    x_bytes = jnp.dtype(x_equi_shc.dtype).itemsize
    cost = pl.CostEstimate(
        flops=int(2 * N * G * _N_SHC),
        transcendentals=int(N * G),
        bytes_accessed=int(a_bytes * N * GB + x_bytes * (N * B + N * G)
                           + 4 * N + 4 * (rep.size + sel.size)),
    )

    out = pl.pallas_call(
        _reconstruction_kernel,
        out_shape=jax.ShapeDtypeStruct((N_pad, G), x_equi_shc.dtype),
        grid_spec=pl.GridSpec(
            grid=grid,
            in_specs=[
                pl.BlockSpec((TN, GB), lambda n: (n, 0)),        # A (packed)
                pl.BlockSpec((TN, B), lambda n: (n, 0)),         # x_equi_shc
                pl.BlockSpec((TN, 1), lambda n: (n, 0)),         # iso
                pl.BlockSpec((1, G), lambda n: (0, 0)),          # table (replicated)
                pl.BlockSpec((_N_SHC, GB), lambda n: (0, 0)),    # rep (replicated)
                pl.BlockSpec((GB, G), lambda n: (0, 0)),         # sel (replicated)
            ],
            out_specs=pl.BlockSpec((TN, G), lambda n: (n, 0)),
        ),
        compiler_params=pltpu.CompilerParams(
            dimension_semantics=("parallel",),
            vmem_limit_bytes=vmem_limit_bytes,
        ),
        cost_estimate=cost,
    )(A_f, x_f, iso_f, table_f, rep, sel)

    return out[:N].reshape(di, dj, dk, G)


def reconstruction_ref(x_equi_shc, iso, table, A):
    """Pure-JAX reference matching the PyTorch forward."""
    G = A.shape[3]
    beta = jnp.exp(-iso[:, :, :, None] * table[None, None, None])
    intra = jnp.einsum('ijkgb,ijkb->ijkg', A, x_equi_shc[..., :-2])
    extra = jnp.einsum('ijkg,ijkb->ijkg', beta, x_equi_shc[..., 45:46])
    trap = jnp.einsum('gb,ijkb->ijkg', jnp.ones((G, 1), x_equi_shc.dtype),
                      x_equi_shc[..., 46:47])
    return intra + extra + trap


if __name__ == "__main__":
    key = jax.random.PRNGKey(0)

    def make_inputs(k, di, dj, dk, G, B=47):
        k1, k2, k3, k4 = jax.random.split(k, 4)
        x_equi_shc = jax.random.normal(k1, (di, dj, dk, B), dtype=jnp.float32)
        iso = jax.random.uniform(k2, (di, dj, dk), dtype=jnp.float32)
        table = jax.random.uniform(k3, (G,), dtype=jnp.float32) * 3.0
        A = jax.random.normal(k4, (di, dj, dk, G, B - 2), dtype=jnp.float32) * 0.1
        return x_equi_shc, iso, table, A

    # Case 1: small, single-tile grid.
    k1, k2 = jax.random.split(key)
    x, iso, table, A = make_inputs(k1, 2, 4, 4, G=16)
    out = reconstruction_pallas(x, iso, table, A)
    jax.block_until_ready(out)
    ref = reconstruction_ref(x, iso, table, A)
    assert out.shape == ref.shape, (out.shape, ref.shape)
    assert jnp.allclose(out, ref, atol=1e-4, rtol=1e-4), \
        float(jnp.max(jnp.abs(out - ref)))

    # Case 2: odd-shaped volume with a small tile to exercise multi-step grid
    # and the padded tail path (N = 105 voxels, TN = 16, grid = 7).
    x2, iso2, table2, A2 = make_inputs(k2, 3, 5, 7, G=16)
    out2 = reconstruction_pallas(x2, iso2, table2, A2, tile_voxels=16)
    jax.block_until_ready(out2)
    ref2 = reconstruction_ref(x2, iso2, table2, A2)
    assert out2.shape == ref2.shape, (out2.shape, ref2.shape)
    assert jnp.allclose(out2, ref2, atol=1e-4, rtol=1e-4), \
        float(jnp.max(jnp.abs(out2 - ref2)))

    print("KERNEL_OK")
</pallas_src>

<mosaic_0001>
module attributes {stable_mosaic.version = 11 : i64} {
  func.func @_reconstruction_kernel(%arg0: i32, %arg1: memref<32x720xf32, #tpu.memory_space<vmem>>, %arg2: memref<32x47xf32, #tpu.memory_space<vmem>>, %arg3: memref<32x1xf32, #tpu.memory_space<vmem>>, %arg4: memref<1x16xf32, #tpu.memory_space<vmem>>, %arg5: memref<45x720xf32, #tpu.memory_space<vmem>>, %arg6: memref<720x16xf32, #tpu.memory_space<vmem>>, %arg7: memref<32x16xf32, #tpu.memory_space<vmem>>) attributes {dimension_semantics = [#tpu.dimension_semantics<parallel>], iteration_bounds = array<i64: 1>, scalar_prefetch = 0 : i64, scratch_operands = 0 : i64, tpu.core_type = #tpu.core_type<tc>, window_params = [{transform_indices = @transform_0, window_bounds = array<i64: 32, 720>}, {transform_indices = @transform_1, window_bounds = array<i64: 32, 47>}, {transform_indices = @transform_2, window_bounds = array<i64: 32, 1>}, {pipeline_mode = #tpu.pipeline_mode<synchronous>, transform_indices = @transform_3, window_bounds = array<i64: 1, 16>}, {pipeline_mode = #tpu.pipeline_mode<synchronous>, transform_indices = @transform_4, window_bounds = array<i64: 45, 720>}, {pipeline_mode = #tpu.pipeline_mode<synchronous>, transform_indices = @transform_5, window_bounds = array<i64: 720, 16>}, {transform_indices = @transform_6, window_bounds = array<i64: 32, 16>}]} {
    %c0 = arith.constant 0 : index
    %c0_0 = arith.constant 0 : index
    %0 = vector.load %arg1[%c0, %c0_0] : memref<32x720xf32, #tpu.memory_space<vmem>>, vector<32x720xf32>
    %c0_1 = arith.constant 0 : index
    %c0_2 = arith.constant 0 : index
    %1 = vector.load %arg2[%c0_1, %c0_2] : memref<32x47xf32, #tpu.memory_space<vmem>>, vector<32x47xf32>
    %c0_3 = arith.constant 0 : index
    %c0_4 = arith.constant 0 : index
    %2 = vector.load %arg3[%c0_3, %c0_4] : memref<32x1xf32, #tpu.memory_space<vmem>>, vector<32x1xf32>
    %c0_5 = arith.constant 0 : index
    %c0_6 = arith.constant 0 : index
    %3 = vector.load %arg4[%c0_5, %c0_6] : memref<1x16xf32, #tpu.memory_space<vmem>>, vector<1x16xf32>
    %4 = vector.extract_strided_slice %1 {offsets = [0, 0], sizes = [32, 45], strides = [1, 1]} : vector<32x47xf32> to vector<32x45xf32>
    %5 = vector.extract_strided_slice %1 {offsets = [0, 45], sizes = [32, 1], strides = [1, 1]} : vector<32x47xf32> to vector<32x1xf32>
    %6 = vector.extract_strided_slice %1 {offsets = [0, 46], sizes = [32, 1], strides = [1, 1]} : vector<32x47xf32> to vector<32x1xf32>
    %c0_7 = arith.constant 0 : index
    %c0_8 = arith.constant 0 : index
    %7 = vector.load %arg5[%c0_7, %c0_8] : memref<45x720xf32, #tpu.memory_space<vmem>>, vector<45x720xf32>
    %cst = arith.constant dense<0.000000e+00> : vector<32x720xf32>
    %8 = tpu.matmul %4, %7, %cst {dimension_numbers = #tpu.dot_dimension_numbers<[1], [0], [0], [1], [0, 0, 1, 1], [], []>} : vector<32x45xf32>, vector<45x720xf32>, vector<32x720xf32> -> vector<32x720xf32>
    %9 = arith.mulf %0, %8 : vector<32x720xf32>
    %c0_9 = arith.constant 0 : index
    %c0_10 = arith.constant 0 : index
    %10 = vector.load %arg6[%c0_9, %c0_10] : memref<720x16xf32, #tpu.memory_space<vmem>>, vector<720x16xf32>
    %cst_11 = arith.constant dense<0.000000e+00> : vector<32x16xf32>
    %11 = tpu.matmul %9, %10, %cst_11 {dimension_numbers = #tpu.dot_dimension_numbers<[1], [0], [0], [1], [0, 0, 1, 1], [], []>} : vector<32x720xf32>, vector<720x16xf32>, vector<32x16xf32> -> vector<32x16xf32>
    %cst_12 = arith.constant 0.000000e+00 : f32
    %12 = vector.broadcast %cst_12 : f32 to vector<32x1xf32>
    %13 = arith.subf %12, %2 : vector<32x1xf32>
    %14 = vector.broadcast %13 : vector<32x1xf32> to vector<32x16xf32>
    %15 = vector.broadcast %3 : vector<1x16xf32> to vector<32x16xf32>
    %16 = arith.mulf %14, %15 : vector<32x16xf32>
    %17 = math.exp %16 : vector<32x16xf32>
    %18 = vector.broadcast %5 : vector<32x1xf32> to vector<32x16xf32>
    %19 = arith.mulf %17, %18 : vector<32x16xf32>
    %20 = arith.addf %11, %19 : vector<32x16xf32>
    %21 = vector.broadcast %6 : vector<32x1xf32> to vector<32x16xf32>
    %22 = arith.addf %20, %21 : vector<32x16xf32>
    %c0_13 = arith.constant 0 : index
    %c0_14 = arith.constant 0 : index
    %23 = vector.load %arg7[%c0_13, %c0_14] : memref<32x16xf32, #tpu.memory_space<vmem>>, vector<32x16xf32>
    tpu.vector_store %arg7[%c0_13, %c0_14], %22 {strides = array<i32>} : memref<32x16xf32, #tpu.memory_space<vmem>>, vector<32x16xf32>,
    return
  }
  func.func @transform_0(%arg0: i32) -> (i32, i32) {
    %c0_i32 = arith.constant 0 : i32
    %c0_i32_0 = arith.constant 0 : i32
    return %arg0, %c0_i32 : i32, i32
  }
  func.func @transform_1(%arg0: i32) -> (i32, i32) {
    %c0_i32 = arith.constant 0 : i32
    %c0_i32_0 = arith.constant 0 : i32
    return %arg0, %c0_i32 : i32, i32
  }
  func.func @transform_2(%arg0: i32) -> (i32, i32) {
    %c0_i32 = arith.constant 0 : i32
    %c0_i32_0 = arith.constant 0 : i32
    return %arg0, %c0_i32 : i32, i32
  }
  func.func @transform_3(%arg0: i32) -> (i32, i32) {
    %c0_i32 = arith.constant 0 : i32
    %c0_i32_0 = arith.constant 0 : i32
    %c0_i32_1 = arith.constant 0 : i32
    return %c0_i32, %c0_i32_0 : i32, i32
  }
  func.func @transform_4(%arg0: i32) -> (i32, i32) {
    %c0_i32 = arith.constant 0 : i32
    %c0_i32_0 = arith.constant 0 : i32
    %c0_i32_1 = arith.constant 0 : i32
    return %c0_i32, %c0_i32_0 : i32, i32
  }
  func.func @transform_5(%arg0: i32) -> (i32, i32) {
    %c0_i32 = arith.constant 0 : i32
    %c0_i32_0 = arith.constant 0 : i32
    %c0_i32_1 = arith.constant 0 : i32
    return %c0_i32, %c0_i32_0 : i32, i32
  }
  func.func @transform_6(%arg0: i32) -> (i32, i32) {
    %c0_i32 = arith.constant 0 : i32
    %c0_i32_0 = arith.constant 0 : i32
    return %arg0, %c0_i32 : i32, i32
  }
}

</mosaic_0001>

<bundles_post_ra>
// kernel: tpu_custom_call.1
= control target key start
LH: loop header
LB: loop body
LE: loop exit
PB: predicated region body
PF: predicated region fallthrough
CT: control target
= control target key end

     0   :  { %vm105_vm0 = vcmask 1044480   ;;  %vm92_vm1 = vcmask 367616   ;;  %vm471_vm2 = vcmask 654336   ;;  %vm678_vm3 = vcmask 130048   ;;  %s1346_s4 = inlined_call_operand.vmem [shape: f32[45,720], index: 4, kind: input, shape index: {}]   ;;  %s1347_s1 = inlined_call_operand.vmem [shape: f32[32,47], index: 1, kind: input, shape index: {}]   ;;  %s1348_s5 = inlined_call_operand.vmem [shape: f32[720,16], index: 5, kind: input, shape index: {}]   ;;  %s1349_s3 = inlined_call_operand.vmem [shape: f32[1,16], index: 3, kind: input, shape index: {}]   ;;  %s1350_s2 = inlined_call_operand.vmem [shape: f32[32,1], index: 2, kind: input, shape index: {}]   ;;  %s1351_s0 = inlined_call_operand.vmem [shape: f32[32,720], index: 0, kind: input, shape index: {}]   ;;  %s1352_s6 = inlined_call_operand.vmem [shape: f32[32,16], index: 6, kind: output, shape index: {}]  }
   0x1   :  { %v86_v0 = vld [vmem:[%s1346_s4 + $0xf0] sm:$0x1f]  ;;  %v80_v1 = vld [vmem:[%s1346_s4 + $0xc0] sm:$0xff]  ;;  %v87_v2 = vld [vmem:[%s1346_s4 + $0xf8] sm:$0x1f] }
   0x2   :  { %687 = vmatpush.msk.msra.mxu0 %vm105_vm0, %v86_v0  ;;  %692 = vmatpush.msk.msra.mxu1 %vm105_vm0, %v87_v2  ;;  %v81_v3 = vld [vmem:[%s1346_s4 + $0xc8] sm:$0xff]  ;;  %v88_v4 = vld [vmem:[%s1346_s4 + $0x100] sm:$0x1f]  ;;  %v74_v5 = vld [vmem:[%s1346_s4 + $0x90] sm:$0xff] }
   0x3   :  { %697 = vmatpush.msk.msra.mxu2 %vm105_vm0, %v88_v4  ;;  %v75_v6 = vld [vmem:[%s1346_s4 + $0x98] sm:$0xff]  ;;  %v82_v7 = vld [vmem:[%s1346_s4 + $0xd0] sm:$0xff]  ;;  %v68_v8 = vld [vmem:[%s1346_s4 + $0x60] sm:$0xff] }
   0x4   :  { %135 = vmatpush.msra.mxu0 %v80_v1  ;;  %164 = vmatpush.msra.mxu1 %v81_v3  ;;  %v89_v9 = vld [vmem:[%s1346_s4 + $0x108] sm:$0x1f]  ;;  %v76_v11 = vld [vmem:[%s1346_s4 + $0xa0] sm:$0xff]  ;;  %v83_v12 = vld [vmem:[%s1346_s4 + $0xd8] sm:$0xff] }
   0x5   :  { %193 = vmatpush.msra.mxu2 %v82_v7  ;;  %702 = vmatpush.msk.msra.mxu3 %vm105_vm0, %v89_v9  ;;  %v69_v10 = vld [vmem:[%s1346_s4 + $0x68] sm:$0xff]  ;;  %v70_v13 = vld [vmem:[%s1346_s4 + $0x70] sm:$0xff]  ;;  %v63_v16 = vld [vmem:[%s1346_s4 + $0x38] sm:$0xff] }
   0x6   :  { %136 = vmatpush.msra.mxu0 %v74_v5  ;;  %165 = vmatpush.msra.mxu1 %v75_v6  ;;  %v77_v14 = vld [vmem:[%s1346_s4 + $0xa8] sm:$0xff]  ;;  %v62_v15 = vld [vmem:[%s1346_s4 + $0x30] sm:$0xff]  ;;  %v64_v17 = vld [vmem:[%s1346_s4 + $0x40] sm:$0xff] }
   0x7   :  { %194 = vmatpush.msra.mxu2 %v76_v11  ;;  %222 = vmatpush.msra.mxu3 %v83_v12  ;;  %v71_v18 = vld [vmem:[%s1346_s4 + $0x78] sm:$0xff]  ;;  %v56_v19 = vld [vmem:[%s1346_s4] sm:$0xff]  ;;  %v57_v20 = vld [vmem:[%s1346_s4 + $0x8] sm:$0xff] }
   0x8   :  { %137 = vmatpush.msra.mxu0 %v68_v8  ;;  %166 = vmatpush.msra.mxu1 %v69_v10  ;;  %v849_v21 = vld [vmem:[%s1347_s1] sm:$0xff]  ;;  %v90_v22 = vld [vmem:[%s1346_s4 + $0x110] sm:$0x1f]  ;;  %v91_v23 = vld [vmem:[%s1346_s4 + $0x118] sm:$0x1f] }
   0x9   :  { %195 = vmatpush.msra.mxu2 %v70_v13  ;;  %223 = vmatpush.msra.mxu3 %v77_v14  ;;  %v58_v24 = vld [vmem:[%s1346_s4 + $0x10] sm:$0xff]  ;;  %v65_v25 = vld [vmem:[%s1346_s4 + $0x48] sm:$0xff]  ;;  %v84_v26 = vld [vmem:[%s1346_s4 + $0xe0] sm:$0xff] }
   0xa   :  { %138 = vmatpush.msra.mxu0 %v62_v15  ;;  %167 = vmatpush.msra.mxu1 %v63_v16  ;;  %v59_v27 = vld [vmem:[%s1346_s4 + $0x18] sm:$0xff]  ;;  %v85_v28 = vld [vmem:[%s1346_s4 + $0xe8] sm:$0xff]  ;;  %v78_v29 = vld [vmem:[%s1346_s4 + $0xb0] sm:$0xff] }
   0xb   :  { %196 = vmatpush.msra.mxu2 %v64_v17  ;;  %224 = vmatpush.msra.mxu3 %v71_v18  ;;  %v79_v30 = vld [vmem:[%s1346_s4 + $0xb8] sm:$0xff]  ;;  %v72_v31 = vld [vmem:[%s1346_s4 + $0x80] sm:$0xff]  ;;  %v894_v32 = vld [vmem:[%s1347_s1 + $0x8] sm:$0xff] }
   0xc   :  { %139 = vmatpush.msra.mxu0 %v56_v19  ;;  %168 = vmatpush.msra.mxu1 %v57_v20  ;;  %v73_v33 = vld [vmem:[%s1346_s4 + $0x88] sm:$0xff]  ;;  %v66_v34 = vld [vmem:[%s1346_s4 + $0x50] sm:$0xff]  ;;  %v67_v35 = vld [vmem:[%s1346_s4 + $0x58] sm:$0xff] }
   0xd   :  { %688 = vmatmul.msk.f32.vlgmr.msra.gmra.mxu0 %vm92_vm1, %v849_v21  ;;  %693 = vmatmul.msk.f32.vlgmr.msra.gmra.mxu1 %vm92_vm1, %v849_v21  ;;  %v60_v36 = vld [vmem:[%s1346_s4 + $0x20] sm:$0xff]  ;;  %v61_v37 = vld [vmem:[%s1346_s4 + $0x28] sm:$0xff]  ;;  %v922_v38 = vld [vmem:[%s1347_s1 + $0x10] sm:$0xff] }
   0xe   :  { %707 = vmatpush.msk.msrb.mxu0 %vm105_vm0, %v90_v22  ;;  %712 = vmatpush.msk.msrb.mxu1 %vm105_vm0, %v91_v23  ;;  %v935_v39 = vld [vmem:[%s1347_s1 + $0x18] sm:$0xff]  ;;  %v336_v42 = vld [vmem:[%s1348_s5 + $0x70] sm:$0xff]  ;;  %v335_v44 = vld [vmem:[%s1348_s5 + $0x68] sm:$0xff] }
   0xf   :  { %197 = vmatpush.msra.mxu2 %v58_v24  ;;  %225 = vmatpush.msra.mxu3 %v65_v25  ;;  %v337_v40 = vld [vmem:[%s1348_s5 + $0x78] sm:$0xff]  ;;  %v352_v43 = vld [vmem:[%s1348_s5 + $0xf0] sm:$0xff]  ;;  %v351_v45 = vld [vmem:[%s1348_s5 + $0xe8] sm:$0xff] }
  0x10   :  { %698 = vmatmul.msk.f32.vlgmr.msra.gmra.mxu2 %vm92_vm1, %v849_v21  ;;  %251 = vmatpush.msrb.mxu0 %v84_v26  ;;  %v353_v41 = vld [vmem:[%s1348_s5 + $0xf8] sm:$0xff]  ;;  %v368_v47 = vld [vmem:[%s1348_s5 + $0x170] sm:$0xff]  ;;  %v334_v49 = vld [vmem:[%s1348_s5 + $0x60] sm:$0xff] }
  0x11   :  { %226 = vmatpush.msra.mxu3 %v59_v27  ;;  %280 = vmatpush.msrb.mxu1 %v85_v28  ;;  %v369_v46 = vld [vmem:[%s1348_s5 + $0x178] sm:$0xff]  ;;  %v350_v50 = vld [vmem:[%s1348_s5 + $0xe0] sm:$0xff]  ;;  %v367_v51 = vld [vmem:[%s1348_s5 + $0x168] sm:$0xff] }
  0x12   :  { %703 = vmatmul.msk.f32.vlgmr.msra.gmra.mxu3 %vm92_vm1, %v849_v21  ;;  %252 = vmatpush.msrb.mxu0 %v78_v29  ;;  %v385_v48 = vld [vmem:[%s1348_s5 + $0x1f8] sm:$0xff]  ;;  %v384_v52 = vld [vmem:[%s1348_s5 + $0x1f0] sm:$0xff]  ;;  %v366_v55 = vld [vmem:[%s1348_s5 + $0x160] sm:$0xff] }
  0x13   :  { %281 = vmatpush.msrb.mxu1 %v79_v30  ;;  %484 = vmatpush.msrb.mxu2 %v337_v40  ;;  %v333_v53 = vld [vmem:[%s1348_s5 + $0x58] sm:$0xff]  ;;  %v383_v56 = vld [vmem:[%s1348_s5 + $0x1e8] sm:$0xff]  ;;  %v332_v57 = vld [vmem:[%s1348_s5 + $0x50] sm:$0xff] }
  0x14   :  { %253 = vmatpush.msrb.mxu0 %v72_v31  ;;  %513 = vmatpush.msrb.mxu3 %v353_v41  ;;  %v349_v54 = vld [vmem:[%s1348_s5 + $0xd8] sm:$0xff]  ;;  %v348_v58 = vld [vmem:[%s1348_s5 + $0xd0] sm:$0xff]  ;;  %v382_v60 = vld [vmem:[%s1348_s5 + $0x1e0] sm:$0xff] }
  0x15   :  { %689 = vmatmul.msk.f32.gmra.mxu0 %vm92_vm1, %v894_v32  ;;  %694 = vmatmul.msk.f32.gmra.mxu1 %vm92_vm1, %v894_v32  ;;  %v365_v59 = vld [vmem:[%s1348_s5 + $0x158] sm:$0xff]  ;;  %v331_v61 = vld [vmem:[%s1348_s5 + $0x48] sm:$0xff]  ;;  %v330_v63 = vld [vmem:[%s1348_s5 + $0x40] sm:$0xff] }
  0x16   :  { %282 = vmatpush.msrb.mxu1 %v73_v33  ;;  %254 = vmatpush.msrb.mxu0 %v66_v34  ;;  %v347_v62 = vld [vmem:[%s1348_s5 + $0xc8] sm:$0xff]  ;;  %v346_v0 = vld [vmem:[%s1348_s5 + $0xc0] sm:$0xff]  ;;  %v364_v1 = vld [vmem:[%s1348_s5 + $0x150] sm:$0xff] }
  0x17   :  { %514 = vmatpush.msrb.mxu3 %v352_v43  ;;  %485 = vmatpush.msrb.mxu2 %v336_v42  ;;  %v381_v2 = vld [vmem:[%s1348_s5 + $0x1d8] sm:$0xff]  ;;  %v363_v5 = vld [vmem:[%s1348_s5 + $0x148] sm:$0xff]  ;;  %v380_v6 = vld [vmem:[%s1348_s5 + $0x1d0] sm:$0xff]  ;;  %v741_v43 = vmov 0  }
  0x18   :  { %699 = vmatmul.msk.f32.gmra.mxu2 %vm92_vm1, %v894_v32  ;;  %283 = vmatpush.msrb.mxu1 %v67_v35  ;;  %v329_v3 = vld [vmem:[%s1348_s5 + $0x38] sm:$0xff]  ;;  %v328_v7 = vld [vmem:[%s1348_s5 + $0x30] sm:$0xff]  ;;  %v362_v9 = vld [vmem:[%s1348_s5 + $0x140] sm:$0xff] }
  0x19   :  { %255 = vmatpush.msrb.mxu0 %v60_v36  ;;  %486 = vmatpush.msrb.mxu2 %v335_v44  ;;  %v345_v4 = vld [vmem:[%s1348_s5 + $0xb8] sm:$0xff]  ;;  %v344_v8 = vld [vmem:[%s1348_s5 + $0xb0] sm:$0xff]  ;;  %v379_v10 = vld [vmem:[%s1348_s5 + $0x1c8] sm:$0xff] }
  0x1a   :  { %704 = vmatmul.msk.f32.gmra.mxu3 %vm92_vm1, %v894_v32  ;;  %284 = vmatpush.msrb.mxu1 %v61_v37  ;;  %v327_v11 = vld [vmem:[%s1348_s5 + $0x28] sm:$0xff]  ;;  %v326_v13 = vld [vmem:[%s1348_s5 + $0x20] sm:$0xff]  ;;  %v361_v15 = vld [vmem:[%s1348_s5 + $0x138] sm:$0xff] }
  0x1b   :  { %542 = vmatpush.msra.mxu0 %v369_v46  ;;  %515 = vmatpush.msrb.mxu3 %v351_v45  ;;  %v343_v12 = vld [vmem:[%s1348_s5 + $0xa8] sm:$0xff]  ;;  %v342_v14 = vld [vmem:[%s1348_s5 + $0xa0] sm:$0xff]  ;;  %v325_v17 = vld [vmem:[%s1348_s5 + $0x18] sm:$0xff] }
  0x1c   :  { %571 = vmatpush.msra.mxu1 %v385_v48  ;;  %487 = vmatpush.msrb.mxu2 %v334_v49  ;;  %v378_v16 = vld [vmem:[%s1348_s5 + $0x1c0] sm:$0xff]  ;;  %v341_v18 = vld [vmem:[%s1348_s5 + $0x98] sm:$0xff]  ;;  %v324_v19 = vld [vmem:[%s1348_s5 + $0x10] sm:$0xff] }
  0x1d   :  { %690 = vmatmul.msk.f32.gmra.mxu0 %vm92_vm1, %v922_v38  ;;  %695 = vmatmul.msk.f32.gmra.mxu1 %vm92_vm1, %v922_v38  ;;  %v340_v20 = vld [vmem:[%s1348_s5 + $0x90] sm:$0xff]  ;;  %v323_v22 = vld [vmem:[%s1348_s5 + $0x8] sm:$0xff]  ;;  %v377_v24 = vld [vmem:[%s1348_s5 + $0x1b8] sm:$0xff] }
  0x1e   :  { %543 = vmatpush.msra.mxu0 %v368_v47  ;;  %516 = vmatpush.msrb.mxu3 %v350_v50  ;;  %v360_v23 = vld [vmem:[%s1348_s5 + $0x130] sm:$0xff]  ;;  %v322_v25 = vld [vmem:[%s1348_s5] sm:$0xff]  ;;  %v339_v26 = vld [vmem:[%s1348_s5 + $0x88] sm:$0xff] }
  0x1f   :  { %572 = vmatpush.msra.mxu1 %v384_v52  ;;  %488 = vmatpush.msrb.mxu2 %v333_v53  ;;  %v359_v27 = vld [vmem:[%s1348_s5 + $0x128] sm:$0xff]  ;;  %v376_v28 = vld [vmem:[%s1348_s5 + $0x1b0] sm:$0xff]  ;;  %v338_v29 = vld [vmem:[%s1348_s5 + $0x80] sm:$0xff] }
  0x20   :  { %700 = vmatmul.msk.f32.gmra.mxu2 %vm92_vm1, %v922_v38  ;;  %544 = vmatpush.msra.mxu0 %v367_v51  ;;  %v401_v30 = vld [vmem:[%s1348_s5 + $0x278] sm:$0xff]  ;;  %v358_v31 = vld [vmem:[%s1348_s5 + $0x120] sm:$0xff]  ;;  %v375_v33 = vld [vmem:[%s1348_s5 + $0x1a8] sm:$0xff] }
  0x21   :  { %517 = vmatpush.msrb.mxu3 %v349_v54  ;;  %573 = vmatpush.msra.mxu1 %v383_v56  ;;  %v400_v34 = vld [vmem:[%s1348_s5 + $0x270] sm:$0xff]  ;;  %v411_v35 = vld [vmem:[%s1348_s5 + $0x2c8] sm:$0xff]  ;;  %v357_v36 = vld [vmem:[%s1348_s5 + $0x118] sm:$0xff] }
  0x22   :  { %705 = vmatmul.msk.f32.gmra.mxu3 %vm92_vm1, %v922_v38  ;;  %545 = vmatpush.msra.mxu0 %v366_v55  ;;  %v374_v37 = vld [vmem:[%s1348_s5 + $0x1a0] sm:$0xff]  ;;  %v399_v42 = vld [vmem:[%s1348_s5 + $0x268] sm:$0xff]  ;;  %v356_v44 = vld [vmem:[%s1348_s5 + $0x110] sm:$0xff] }
  0x23   :  { %489 = vmatpush.msrb.mxu2 %v332_v57  ;;  %518 = vmatpush.msrb.mxu3 %v348_v58  ;;  %v51_v40 = vld [vmem:[%s1350_s2] sm:$0xff]  ;;  %v373_v45 = vld [vmem:[%s1348_s5 + $0x198] sm:$0xff]  ;;  %v355_v48 = vld [vmem:[%s1348_s5 + $0x108] sm:$0xff] }
  0x24   :  { %546 = vmatpush.msra.mxu0 %v365_v59  ;;  %574 = vmatpush.msra.mxu1 %v382_v60  ;;  %v412_v41 = vsub.f32 0.0, %v51_v40  ;;  %v398_v46 = vld [vmem:[%s1348_s5 + $0x260] sm:$0xff]  ;;  %v372_v49 = vld [vmem:[%s1348_s5 + $0x190] sm:$0xff]  ;;  %v397_v50 = vld [vmem:[%s1348_s5 + $0x258] sm:$0xff] }
  0x25   :  { %691 = vmatmul.msk.f32.gmra.mxu0 %vm92_vm1, %v935_v39  ;;  %696 = vmatmul.msk.f32.gmra.mxu1 %vm92_vm1, %v935_v39  ;;  %v410_v47 = vld [vmem:[%s1348_s5 + $0x2c0] sm:$0xff]  ;;  %v371_v52 = vld [vmem:[%s1348_s5 + $0x188] sm:$0xff]  ;;  %v409_v53 = vld [vmem:[%s1348_s5 + $0x2b8] sm:$0xff] }
  0x26   :  { %490 = vmatpush.msrb.mxu2 %v331_v61  ;;  %519 = vmatpush.msrb.mxu3 %v347_v62  ;;  %v354_v51 = vld [vmem:[%s1348_s5 + $0x100] sm:$0xff]  ;;  %v396_v54 = vld [vmem:[%s1348_s5 + $0x250] sm:$0xff]  ;;  %v52_v56 = vld [vmem:[%s1350_s2 + $0x8] sm:$0xff] }
  0x27   :  { %547 = vmatpush.msra.mxu0 %v364_v1  ;;  %575 = vmatpush.msra.mxu1 %v381_v2  ;;  %v370_v55 = vld [vmem:[%s1348_s5 + $0x180] sm:$0xff]  ;;  %v413_v57 = vsub.f32 0.0, %v52_v56  ;;  %v395_v58 = vld [vmem:[%s1348_s5 + $0x248] sm:$0xff]  ;;  %v408_v59 = vld [vmem:[%s1348_s5 + $0x2b0] sm:$0xff] }
  0x28   :  { %701 = vmatmul.msk.f32.gmra.mxu2 %vm92_vm1, %v935_v39  ;;  %520 = vmatpush.msrb.mxu3 %v346_v0  ;;  %v394_v60 = vld [vmem:[%s1348_s5 + $0x240] sm:$0xff]  ;;  %v407_v61 = vld [vmem:[%s1348_s5 + $0x2a8] sm:$0xff]  ;;  %v393_v62 = vld [vmem:[%s1348_s5 + $0x238] sm:$0xff] }
  0x29   :  { %491 = vmatpush.msrb.mxu2 %v330_v63  ;;  %548 = vmatpush.msra.mxu0 %v363_v5  ;;  %v392_v63 = vld [vmem:[%s1348_s5 + $0x230] sm:$0xff]  ;;  %v406_v0 = vld [vmem:[%s1348_s5 + $0x2a0] sm:$0xff]  ;;  %v405_v5 = vld [vmem:[%s1348_s5 + $0x298] sm:$0xff] }
  0x2a   :  { %706 = vmatmul.msk.f32.gmra.mxu3 %vm92_vm1, %v935_v39  ;;  %576 = vmatpush.msra.mxu1 %v380_v6  ;;  %v53_v1 = vld [vmem:[%s1350_s2 + $0x10] sm:$0xff]  ;;  %v389_v6 = vld [vmem:[%s1348_s5 + $0x218] sm:$0xff]  ;;  %v31_v40 = vld [vmem:[%s1351_s0 + $0x40] sm:$0xff] }
  0x2b   :  { %492 = vmatpush.msrb.mxu2 %v329_v3  ;;  %521 = vmatpush.msrb.mxu3 %v345_v4  ;;  %v414_v2 = vsub.f32 0.0, %v53_v1  ;;  %v391_v3 = vld [vmem:[%s1348_s5 + $0x228] sm:$0xff]  ;;  %v390_v4 = vld [vmem:[%s1348_s5 + $0x220] sm:$0xff] }
  0x2c   :  { %549 = vmatpush.msra.mxu0 %v362_v9  ;;  %577 = vmatpush.msra.mxu1 %v379_v10  ;;  %v54_v9 = vld [vmem:[%s1350_s2 + $0x18] sm:$0xff]  ;;  %v23_v10 = vld [vmem:[%s1351_s0] sm:$0xff] }
  0x2d   :  { %708 = vmatmul.msk.f32.vlgmr.msrb.gmra.mxu0 %vm92_vm1, %v849_v21  ;;  %713 = vmatmul.msk.f32.vlgmr.msrb.gmra.mxu1 %vm92_vm1, %v849_v21  ;;  %v43_v1 = vld [vmem:[%s1351_s0 + $0xa0] sm:$0xff] }
  0x2e   :  { %493 = vmatpush.msrb.mxu2 %v328_v7  ;;  %522 = vmatpush.msrb.mxu3 %v344_v8  ;;  %v404_v7 = vld [vmem:[%s1348_s5 + $0x290] sm:$0xff] }
  0x2f   :  { %550 = vmatpush.msra.mxu0 %v361_v15  ;;  %578 = vmatpush.msra.mxu1 %v378_v16  ;;  %v388_v8 = vld [vmem:[%s1348_s5 + $0x210] sm:$0xff] }
  0x30   :  { %494 = vmatpush.msrb.mxu2 %v327_v11  ;;  %523 = vmatpush.msrb.mxu3 %v343_v12  ;;  %v415_v11 = vsub.f32 0.0, %v54_v9  ;;  %v24_v12 = vld [vmem:[%s1351_s0 + $0x8] sm:$0xff] }
  0x31   :  { %551 = vmatpush.msra.mxu0 %v360_v23  ;;  %579 = vmatpush.msra.mxu1 %v377_v24  ;;  %v29_v23 = vld [vmem:[%s1351_s0 + $0x30] sm:$0xff]  ;;  %v30_v24 = vld [vmem:[%s1351_s0 + $0x38] sm:$0xff] }
  0x32   :  { %495 = vmatpush.msrb.mxu2 %v326_v13  ;;  %524 = vmatpush.msrb.mxu3 %v342_v14  ;;  %v387_v13 = vld [vmem:[%s1348_s5 + $0x208] sm:$0xff] }
  0x33   :  { %552 = vmatpush.msra.mxu0 %v359_v27  ;;  %580 = vmatpush.msra.mxu1 %v376_v28  ;;  %v403_v14 = vld [vmem:[%s1348_s5 + $0x288] sm:$0xff] }
  0x34   :  { %496 = vmatpush.msrb.mxu2 %v325_v17  ;;  %525 = vmatpush.msrb.mxu3 %v341_v18 }
  0x35   :  { %709 = vmatmul.msk.f32.gmra.mxu0 %vm92_vm1, %v894_v32  ;;  %714 = vmatmul.msk.f32.gmra.mxu1 %vm92_vm1, %v894_v32 }
  0x36   :  { %497 = vmatpush.msrb.mxu2 %v324_v19  ;;  %526 = vmatpush.msrb.mxu3 %v340_v20  ;;  %v742_v19 = vmov 45   ;;  %v386_v20 = vld [vmem:[%s1348_s5 + $0x200] sm:$0xff] }
  0x37   :  { %553 = vmatpush.msra.mxu0 %v358_v31  ;;  %581 = vmatpush.msra.mxu1 %v375_v33  ;;  %v26_v31 = vld [vmem:[%s1351_s0 + $0x18] sm:$0xff] }
  0x38   :  { %498 = vmatpush.msrb.mxu2 %v323_v22  ;;  %527 = vmatpush.msrb.mxu3 %v339_v26  ;;  %v402_v22 = vld [vmem:[%s1348_s5 + $0x280] sm:$0xff] }
  0x39   :  { %724 = vset.pattern.permute.xlu0 %v741_v43  ;;  %554 = vmatpush.msra.mxu0 %v357_v36  ;;  %v35_v36 = vld [vmem:[%s1351_s0 + $0x60] sm:$0xff] }
  0x3a   :  { %499 = vmatpush.msrb.mxu2 %v322_v25  ;;  %528 = vmatpush.msrb.mxu3 %v338_v29  ;;  %v25_v25 = vld [vmem:[%s1351_s0 + $0x10] sm:$0xff] }
  0x3b   :  { %582 = vmatpush.msra.mxu1 %v374_v37  ;;  %418 = vperm.xlu0 %724, %v412_v41   ;;  %v36_v37 = vld [vmem:[%s1351_s0 + $0x68] sm:$0xff] }
  0x3c   :  { %600 = vmatpush.msra.mxu2 %v401_v30  ;;  %635 = vmatpush.msra.mxu3 %v411_v35 }
  0x3d   :  { %710 = vmatmul.msk.f32.gmra.mxu0 %vm92_vm1, %v922_v38  ;;  %715 = vmatmul.msk.f32.gmra.mxu1 %vm92_vm1, %v922_v38 }
  0x3e   :  { %601 = vmatpush.msra.mxu2 %v400_v34  ;;  %555 = vmatpush.msra.mxu0 %v356_v44 }
  0x3f   :  { %583 = vmatpush.msra.mxu1 %v373_v45  ;;  %636 = vmatpush.msra.mxu3 %v410_v47 }
  0x40   :  { %602 = vmatpush.msra.mxu2 %v399_v42  ;;  %556 = vmatpush.msra.mxu0 %v355_v48 }
  0x41   :  { %584 = vmatpush.msra.mxu1 %v372_v49  ;;  %725 = vset.pattern.permute.xlu1 %v741_v43 }
  0x42   :  { %603 = vmatpush.msra.mxu2 %v398_v46  ;;  %557 = vmatpush.msra.mxu0 %v354_v51  ;;  %v32_v46 = vld [vmem:[%s1351_s0 + $0x48] sm:$0xff]  ;;  %v42_v51 = vld [vmem:[%s1351_s0 + $0x98] sm:$0xff] }
  0x43   :  { %585 = vmatpush.msra.mxu1 %v371_v52  ;;  %637 = vmatpush.msra.mxu3 %v409_v53  ;;  %v37_v52 = vld [vmem:[%s1351_s0 + $0x70] sm:$0xff] }
  0x44   :  { %604 = vmatpush.msra.mxu2 %v397_v50  ;;  %423 = vperm.xlu0 %724, %v413_v57   ;;  %v41_v50 = vld [vmem:[%s1351_s0 + $0x90] sm:$0xff] }
  0x45   :  { %711 = vmatmul.msk.f32.gmra.mxu0 %vm92_vm1, %v935_v39  ;;  %716 = vmatmul.msk.f32.gmra.mxu1 %vm92_vm1, %v935_v39 }
  0x46   :  { %605 = vmatpush.msra.mxu2 %v396_v54  ;;  %586 = vmatpush.msra.mxu1 %v370_v55 }
  0x47   :  { %638 = vmatpush.msra.mxu3 %v408_v59  ;;  %428 = vperm.xlu1 %725, %v414_v2  }
  0x48   :  { %606 = vmatpush.msra.mxu2 %v395_v58  ;;  %726 = vset.pattern.permute.xlu2 %v742_v19  ;;  %v38_v58 = vld [vmem:[%s1351_s0 + $0x78] sm:$0xff] }
  0x49   :  { %639 = vmatpush.msra.mxu3 %v407_v61  ;;  %452 = vperm.xlu2 %726, %v849_v21  }
  0x4a   :  { %607 = vmatpush.msra.mxu2 %v394_v60 }
  0x4b   :  { %640 = vmatpush.msra.mxu3 %v406_v0  ;;  %v28_v0 = vld [vmem:[%s1351_s0 + $0x28] sm:$0xff] }
  0x4c   :  { %608 = vmatpush.msra.mxu2 %v393_v62  ;;  %727 = vset.pattern.permute.xlu0 %v742_v19  ;;  %v743_v62 = vmov 46  }
  0x4d   :  { %641 = vmatpush.msra.mxu3 %v405_v5  ;;  %460 = vperm.xlu0 %727, %v922_v38  }
  0x4e   :  { %609 = vmatpush.msra.mxu2 %v392_v63  ;;  %v27_v63 = vld [vmem:[%s1351_s0 + $0x20] sm:$0xff] }
  0x4f   :  { %642 = vmatpush.msra.mxu3 %v404_v7  ;;  %433 = vperm.xlu1 %725, %v415_v11  }
  0x50   :  { %610 = vmatpush.msra.mxu2 %v391_v3 }
  0x51   :  { %643 = vmatpush.msra.mxu3 %v403_v14  ;;  %456 = vperm.xlu2 %726, %v894_v32   ;;  %v39_v14 = vld [vmem:[%s1351_s0 + $0x80] sm:$0xff] }
  0x52   :  { %611 = vmatpush.msra.mxu2 %v390_v4 }
  0x53   :  { %644 = vmatpush.msra.mxu3 %v402_v22 }
  0x54   :  { %612 = vmatpush.msra.mxu2 %v389_v6  ;;  %v44_v6 = vld [vmem:[%s1351_s0 + $0xa8] sm:$0xff] }
  0x55   :  { %731 = vset.pattern.permute.xlu0 %v743_v62 }
  0x56   :  { %613 = vmatpush.msra.mxu2 %v388_v8  ;;  %671 = vperm.xlu0 %731, %v935_v39  }
  0x57   :  { %728 = vset.pattern.permute.xlu1 %v742_v19 }
  0x58   :  { %614 = vmatpush.msra.mxu2 %v387_v13  ;;  %464 = vperm.xlu1 %728, %v935_v39   ;;  %v34_v39 = vld [vmem:[%s1351_s0 + $0x58] sm:$0xff] }
  0x59   :  { %729 = vset.pattern.permute.xlu2 %v743_v62 }
  0x5a   :  { %615 = vmatpush.msra.mxu2 %v386_v20  ;;  %659 = vperm.xlu2 %729, %v849_v21   ;;  %v33_v21 = vld [vmem:[%s1351_s0 + $0x50] sm:$0xff]  ;;  %v46_v20 = vld [vmem:[%s1351_s0 + $0xb8] sm:$0xff] }
  0x60   :  { %730 = vset.pattern.permute.xlu1 %v743_v62 }
  0x61   :  { %663 = vperm.xlu1 %730, %v894_v32  }
  0x62   :  { %667 = vperm.xlu2 %729, %v922_v38   ;;  %v45_v38 = vld [vmem:[%s1351_s0 + $0xb0] sm:$0xff] }
  0x8a   :  { %v141_v15 = vpop.f32.mrf.mxu0  ;;  %v170_v16 = vpop.f32.mrf.mxu1 }
  0x8b   :  { %v298_v17 = vmul.f32 %v141_v15, %v23_v10  ;;  %v299_v18 = vmul.f32 %v170_v16, %v24_v12  ;;  %v40_v15 = vld [vmem:[%s1351_s0 + $0x88] sm:$0xff] }
  0x8d   :  { %500 = vmatmul.f32.vlgmr.msrb.gmra.mxu2 %v298_v17  ;;  %529 = vmatmul.f32.vlgmr.msrb.gmra.mxu3 %v299_v18 }
  0x92   :  { %v144_v26 = vpop.f32.mrf.mxu0  ;;  %v173_v27 = vpop.f32.mrf.mxu1 }
  0x93   :  { %v304_v28 = vmul.f32 %v144_v26, %v29_v23  ;;  %v305_v29 = vmul.f32 %v173_v27, %v30_v24  ;;  %v199_v30 = vpop.f32.mrf.mxu2  ;;  %v732_v27 = vld [vmem:[%s1349_s3] ss:$0 sm:$0xff] }
  0x94   :  { %v300_v33 = vmul.f32 %v199_v30, %v25_v25 }
  0x95   :  { %503 = vmatmul.f32.gmra.mxu2 %v304_v28  ;;  %v228_v34 = vpop.f32.mrf.mxu3  ;;  %532 = vmatmul.f32.gmra.mxu3 %v305_v29 }
  0x96   :  { %v301_v35 = vmul.f32 %v228_v34, %v26_v31  ;;  %558 = vmatmul.f32.vlgmr.msra.gmra.mxu0 %v300_v33 }
  0x98   :  { %587 = vmatmul.f32.vlgmr.msra.gmra.mxu1 %v301_v35 }
  0x9a   :  { %v147_v41 = vpop.f32.mrf.mxu0  ;;  %v176_v42 = vpop.f32.mrf.mxu1 }
  0x9b   :  { %v310_v43 = vmul.f32 %v147_v41, %v35_v36  ;;  %v311_v44 = vmul.f32 %v176_v42, %v36_v37  ;;  %v202_v45 = vpop.f32.mrf.mxu2 }
  0x9c   :  { %v306_v47 = vmul.f32 %v202_v45, %v31_v40 }
  0x9d   :  { %506 = vmatmul.f32.gmra.mxu2 %v310_v43  ;;  %v231_v48 = vpop.f32.mrf.mxu3  ;;  %535 = vmatmul.f32.gmra.mxu3 %v311_v44 }
  0x9e   :  { %v307_v49 = vmul.f32 %v231_v48, %v32_v46  ;;  %561 = vmatmul.f32.gmra.mxu0 %v306_v47 }
  0xa0   :  { %590 = vmatmul.f32.gmra.mxu1 %v307_v49 }
  0xa2   :  { %v150_v53 = vpop.f32.mrf.mxu0  ;;  %v179_v54 = vpop.f32.mrf.mxu1 }
  0xa3   :  { %v316_v55 = vmul.f32 %v150_v53, %v41_v50  ;;  %v317_v56 = vmul.f32 %v179_v54, %v42_v51  ;;  %v205_v57 = vpop.f32.mrf.mxu2  ;;  %v453_v41 = vpop.permute.xlu2 %452 }
  0xa4   :  { %v312_v59 = vmul.f32 %v205_v57, %v37_v52 }
  0xa5   :  { %509 = vmatmul.f32.gmra.mxu2 %v316_v55  ;;  %v234_v60 = vpop.f32.mrf.mxu3  ;;  %538 = vmatmul.f32.gmra.mxu3 %v317_v56 }
  0xa6   :  { %v313_v61 = vmul.f32 %v234_v60, %v38_v58  ;;  %564 = vmatmul.f32.gmra.mxu0 %v312_v59 }
  0xa8   :  { %593 = vmatmul.f32.gmra.mxu1 %v313_v61 }
  0xaa   :  { %v257_v32 = vpop.f32.mrf.mxu0  ;;  %v286_v2 = vpop.f32.mrf.mxu1 }
  0xab   :  { %v302_v3 = vmul.f32 %v257_v32, %v27_v63  ;;  %v208_v4 = vpop.f32.mrf.mxu2  ;;  %v303_v5 = vmul.f32 %v286_v2, %v28_v0  ;;  %v457_v52 = vpop.permute.xlu2 %456 }
  0xac   :  { %v318_v7 = vmul.f32 %v208_v4, %v43_v1 }
  0xad   :  { %616 = vmatmul.f32.vlgmr.msra.gmra.mxu2 %v302_v3  ;;  %v237_v8 = vpop.f32.mrf.mxu3  ;;  %717 = vmatmul.msk.f32.vlgmr.msra.gmra.mxu3 %vm471_vm2, %v303_v5  ;;  %v419_v26 = vpop.permute.xlu0 %418 }
  0xae   :  { %v319_v9 = vmul.f32 %v237_v8, %v44_v6  ;;  %567 = vmatmul.f32.gmra.mxu0 %v318_v7  ;;  %v439_v28 = vmul.f32 %v732_v27, %v419_v26 }
  0xb0   :  { %596 = vmatmul.f32.gmra.mxu1 %v319_v9  ;;  %v443_v31 = vmul.f32 1.442695, %v439_v28 }
  0xb2   :  { %v260_v10 = vpop.f32.mrf.mxu0  ;;  %v289_v11 = vpop.f32.mrf.mxu1  ;;  %733 = vpow2.f32 %v443_v31 }
  0xb3   :  { %v308_v12 = vmul.f32 %v260_v10, %v33_v21  ;;  %v309_v13 = vmul.f32 %v289_v11, %v34_v39 }
  0xb4   :  { %v660_v8 = vpop.permute.xlu2 %659 }
  0xb5   :  { %619 = vmatmul.f32.gmra.mxu2 %v308_v12  ;;  %718 = vmatmul.msk.f32.gmra.mxu3 %vm471_vm2, %v309_v13 }
  0xb6   :  { %v424_v33 = vpop.permute.xlu0 %423 }
  0xb7   :  { %v440_v34 = vmul.f32 %v732_v27, %v424_v33 }
  0xb8   :  { %v734_v42 = vpop.eup %733 }
  0xb9   :  { %v429_v37 = vpop.permute.xlu1 %428  ;;  %v445_v40 = vmul.f32 1.442695, %v440_v34  ;;  %v467_v44 = vmul.f32 %v734_v42, %v453_v41 }
  0xba   :  { %v263_v16 = vpop.f32.mrf.mxu0  ;;  %v292_v17 = vpop.f32.mrf.mxu1  ;;  %v441_v43 = vmul.f32 %v732_v27, %v429_v37 }
  0xbb   :  { %v314_v18 = vmul.f32 %v263_v16, %v39_v14  ;;  %v315_v19 = vmul.f32 %v292_v17, %v40_v15  ;;  %735 = vpow2.f32 %v445_v40 }
  0xbc   :  { %v447_v48 = vmul.f32 1.442695, %v441_v43  ;;  %v668_v31 = vpop.permute.xlu2 %667 }
  0xbd   :  { %622 = vmatmul.f32.gmra.mxu2 %v314_v18  ;;  %719 = vmatmul.msk.f32.gmra.mxu3 %vm471_vm2, %v315_v19 }
  0xbe   :  { %737 = vpow2.f32 %v447_v48 }
  0xbf   :  { %v461_v0 = vpop.permute.xlu0 %460 }
  0xc1   :  { %v434_v50 = vpop.permute.xlu1 %433  ;;  %v736_v51 = vpop.eup %735 }
  0xc2   :  { %v266_v22 = vpop.f32.mrf.mxu0  ;;  %v295_v23 = vpop.f32.mrf.mxu1  ;;  %v442_v54 = vmul.f32 %v732_v27, %v434_v50  ;;  %v468_v56 = vmul.f32 %v736_v51, %v457_v52 }
  0xc3   :  { %v320_v24 = vmul.f32 %v266_v22, %v45_v38  ;;  %v321_v25 = vmul.f32 %v295_v23, %v46_v20 }
  0xc4   :  { %v449_v59 = vmul.f32 1.442695, %v442_v54  ;;  %v738_v63 = vpop.eup %737 }
  0xc5   :  { %625 = vmatmul.f32.gmra.mxu2 %v320_v24  ;;  %720 = vmatmul.msk.f32.gmra.mxu3 %vm471_vm2, %v321_v25  ;;  %v469_v2 = vmul.f32 %v738_v63, %v461_v0 }
  0xc6   :  { %739 = vpow2.f32 %v449_v59 }
  0xc8   :  { %v672_v43 = vpop.permute.xlu0 %671 }
  0xca   :  { %v465_v7 = vpop.permute.xlu1 %464 }
  0xcc   :  { %v740_v10 = vpop.eup %739 }
  0xcd   :  { %v470_v15 = vmul.f32 %v740_v10, %v465_v7 }
  0xd3   :  { %v664_v38 = vpop.permute.xlu1 %663 }
 0x110   :  { %v501_v29 = vpop.f32.mrf.mxu2  ;;  %v530_v30 = vpop.f32.mrf.mxu3 }
 0x111   :  { %v502_v49 = vadd.f32 %v501_v29, %v467_v44 }
 0x113   :  { %v559_v47 = vpop.f32.mrf.mxu0  ;;  %v531_v55 = vadd.f32 %v530_v30, %v502_v49 }
 0x115   :  { %v588_v53 = vpop.f32.mrf.mxu1  ;;  %v560_v60 = vadd.f32 %v559_v47, %v531_v55 }
 0x117   :  { %v589_v1 = vadd.f32 %v588_v53, %v560_v60 }
 0x118   :  { %v504_v35 = vpop.f32.mrf.mxu2  ;;  %v533_v36 = vpop.f32.mrf.mxu3 }
 0x119   :  { %v505_v61 = vadd.f32 %v504_v35, %v468_v56 }
 0x11b   :  { %v562_v62 = vpop.f32.mrf.mxu0  ;;  %v534_v32 = vadd.f32 %v533_v36, %v505_v61 }
 0x11d   :  { %v591_v3 = vpop.f32.mrf.mxu1  ;;  %v563_v9 = vadd.f32 %v562_v62, %v534_v32 }
 0x11f   :  { %v592_v13 = vadd.f32 %v591_v3, %v563_v9 }
 0x120   :  { %v507_v45 = vpop.f32.mrf.mxu2  ;;  %v536_v46 = vpop.f32.mrf.mxu3 }
 0x121   :  { %v508_v21 = vadd.f32 %v507_v45, %v469_v2 }
 0x123   :  { %v565_v11 = vpop.f32.mrf.mxu0  ;;  %v537_v14 = vadd.f32 %v536_v46, %v508_v21 }
 0x125   :  { %v594_v19 = vpop.f32.mrf.mxu1  ;;  %v566_v20 = vadd.f32 %v565_v11, %v537_v14 }
 0x127   :  { %v595_v25 = vadd.f32 %v594_v19, %v566_v20 }
 0x128   :  { %v510_v57 = vpop.f32.mrf.mxu2  ;;  %v539_v58 = vpop.f32.mrf.mxu3 }
 0x129   :  { %v511_v22 = vadd.f32 %v510_v57, %v470_v15 }
 0x12b   :  { %v540_v26 = vadd.f32 %v539_v58, %v511_v22  ;;  %v568_v27 = vpop.f32.mrf.mxu0 }
 0x12d   :  { %v569_v33 = vadd.f32 %v568_v27, %v540_v26  ;;  %v597_v35 = vpop.f32.mrf.mxu1 }
 0x12f   :  { %v598_v37 = vadd.f32 %v597_v35, %v569_v33 }
 0x130   :  { %v617_v4 = vpop.f32.mrf.mxu2  ;;  %v646_v5 = vpop.f32.mrf.mxu3 }
 0x131   :  { %v618_v6 = vadd.f32 %v617_v4, %v589_v1 }
 0x133   :  { %v647_v39 = vadd.f32 %v646_v5, %v618_v6 }
 0x135   :  { %v674_v12 = vadd.f32 %v660_v8, %v647_v39 }
 0x137   :  { %679 = vst.msk [vmem:[%s1352_s6] sm:$0xff] %vm678_vm3, %v674_v12 }
 0x138   :  { %v620_v16 = vpop.f32.mrf.mxu2  ;;  %v649_v17 = vpop.f32.mrf.mxu3 }
 0x139   :  { %v621_v18 = vadd.f32 %v620_v16, %v592_v13 }
 0x13b   :  { %v650_v23 = vadd.f32 %v649_v17, %v621_v18 }
 0x13d   :  { %v675_v24 = vadd.f32 %v664_v38, %v650_v23 }
 0x13f   :  { %680 = vst.msk [vmem:[%s1352_s6 + $0x8] sm:$0xff] %vm678_vm3, %v675_v24 }
 0x140   :  { %v623_v28 = vpop.f32.mrf.mxu2  ;;  %v652_v29 = vpop.f32.mrf.mxu3 }
 0x141   :  { %v624_v30 = vadd.f32 %v623_v28, %v595_v25 }
 0x143   :  { %v653_v34 = vadd.f32 %v652_v29, %v624_v30 }
 0x145   :  { %v676_v36 = vadd.f32 %v668_v31, %v653_v34 }
 0x147   :  { %681 = vst.msk [vmem:[%s1352_s6 + $0x10] sm:$0xff] %vm678_vm3, %v676_v36 }
 0x148   :  { %v626_v40 = vpop.f32.mrf.mxu2  ;;  %v655_v41 = vpop.f32.mrf.mxu3 }
 0x149   :  { %v627_v42 = vadd.f32 %v626_v40, %v598_v37 }
 0x14b   :  { %v656_v44 = vadd.f32 %v655_v41, %v627_v42 }
 0x14d   :  { %v677_v45 = vadd.f32 %v672_v43, %v656_v44 }
 0x14f   :  { %682 = vst.msk [vmem:[%s1352_s6 + $0x18] sm:$0xff] %vm678_vm3, %v677_v45 }

</bundles_post_ra>
